<compile_context>
chip_gen: v5e
topology: v5e:2x2
jax: 0.10.0
libtpu: 0.0.40
codegen_flags: <defaults>
</compile_context>

<pallas_src>
import jax
import jax.numpy as jnp
from jax import lax
from jax.experimental import pallas as pl
from jax.experimental.pallas import tpu as pltpu
import numpy as np


def _hilbert_kernel(x_ref, m_ref, pha_ref, amp_ref):
    """One row tile: fused complex matmul + phase/amplitude tail.

    x_ref   : (TILE_M, NP)     packed real rows
    m_ref   : (NP, 2*NP)       [M_real | M_imag] (block-diagonal) transform
    pha_ref : (TILE_M, NP)
    amp_ref : (TILE_M, NP)
    """
    np_ = x_ref.shape[-1]
    x = x_ref[...]
    # Single MXU pass -> [yr | yi] lane-concatenated (lane width 2*NP).
    y = jnp.dot(x, m_ref[...], preferred_element_type=jnp.float32)
    yr = y[:, :np_]
    yi = y[:, np_:]
    pha_ref[...] = jnp.arctan2(yi, yr)
    h2 = yr * yr + yi * yi
    # sqrt via EUP rsqrt (free slot while atan2 occupies the VALU);
    # tiny epsilon keeps rsqrt(0) finite so amp(0) == 0 exactly.
    amp_ref[...] = h2 * lax.rsqrt(h2 + 1e-30)


def _build_hilbert_matrix(n: int):
    """Real/imag parts of M (n x n) with  ifft(fft(x)*2u) == x @ M  for a real row x.

    Built by pushing identity rows through the exact FFT -> mask -> IFFT chain
    in float64 (matches the torch module bit-for-bit up to f32 rounding)."""
    f = np.concatenate([
        np.arange(0, (n - 1) // 2 + 1, dtype=np.float64) / float(n),
        np.arange(-(n // 2), 0, dtype=np.float64) / float(n),
    ])
    u = 1.0 / (1.0 + np.exp(-50.0 * f))                 # sigmoid(50 * f)
    eye = np.eye(n, dtype=np.float64)
    m = np.fft.ifft(np.fft.fft(eye, axis=-1) * (2.0 * u), axis=-1)  # row m = T(e_m)
    return m.real.astype(np.float32), m.imag.astype(np.float32)


@jax.jit
def hilbert_forward(x):
    """Pallas implementation of Hilbert.forward (dim=-1).

    x: float array, transform along the last axis.
    returns: float32 array of shape x.shape + (2,) -> [..., n, (phase, amplitude)]
    """
    orig_shape = x.shape
    n = int(orig_shape[-1])
    m_rows = int(np.prod(orig_shape[:-1])) if len(orig_shape) > 1 else 1
    x2d = x.reshape(m_rows, n).astype(jnp.float32)

    # --- block-diagonal packing for small n: make the contraction / output
    # lane widths >= 128 so the MXU and vector stores are lane-dense.
    r = max(1, 128 // n) if n < 128 else 1
    n_pack = r * n

    mr, mi = _build_hilbert_matrix(n)
    if r > 1:
        eye_r = np.eye(r, dtype=np.float32)
        mr = np.kron(eye_r, mr)
        mi = np.kron(eye_r, mi)
    # Fused RHS: one matmul produces real and imag parts lane-concatenated.
    m_cat = jnp.asarray(np.concatenate([mr, mi], axis=1))   # (n_pack, 2*n_pack)

    # --- row tiling: keep the double-buffered working set <= ~16 MiB so it
    # fits v5e's scoped default and stays well inside v7x's 64 MiB physical VMEM.
    mat_bytes = 2 * int(m_cat.size) * 4          # resident matrix (double-buffer alloc)
    row_bytes = 6 * n_pack * 4                   # (x + pha + amp), each double-buffered
    budget = 16 * 1024 * 1024 - mat_bytes
    tile_m = max(8, min(512, budget // row_bytes if budget > 0 else 8))
    tile_m = (int(tile_m) // 8) * 8

    m_packed = -(-m_rows // r)                               # ceil(m_rows / r)
    tile_m = min(tile_m, max(8, -(-m_packed // 8) * 8))
    m_packed_pad = -(-m_packed // tile_m) * tile_m
    m_rows_pad = m_packed_pad * r
    if m_rows_pad != m_rows:
        x2d = jnp.pad(x2d, ((0, m_rows_pad - m_rows), (0, 0)))
    x_packed = x2d.reshape(m_packed_pad, n_pack)

    grid = (m_packed_pad // tile_m,)

    pha, amp = pl.pallas_call(
        _hilbert_kernel,
        out_shape=(
            jax.ShapeDtypeStruct((m_packed_pad, n_pack), jnp.float32),
            jax.ShapeDtypeStruct((m_packed_pad, n_pack), jnp.float32),
        ),
        grid=grid,
        in_specs=[
            pl.BlockSpec((tile_m, n_pack), lambda i: (i, 0)),       # x row tiles
            pl.BlockSpec((n_pack, 2 * n_pack), lambda i: (0, 0)),   # resident transform
        ],
        out_specs=(
            pl.BlockSpec((tile_m, n_pack), lambda i: (i, 0)),
            pl.BlockSpec((tile_m, n_pack), lambda i: (i, 0)),
        ),
        compiler_params=pltpu.CompilerParams(
            dimension_semantics=("parallel",),
            vmem_limit_bytes=32 * 1024 * 1024,
        ),
        cost_estimate=pl.CostEstimate(
            flops=int(2 * m_packed_pad * n_pack * (2 * n_pack)),
            transcendentals=int(2 * m_packed_pad * n_pack),
            bytes_accessed=int(4 * (x_packed.size + m_cat.size
                                    + 2 * m_packed_pad * n_pack)),
        ),
    )(x_packed, m_cat)

    pha = pha.reshape(m_rows_pad, n)[:m_rows].reshape(orig_shape)
    amp = amp.reshape(m_rows_pad, n)[:m_rows].reshape(orig_shape)
    # TODO(synk): the final size-2 interleave is required by the module's
    # [..., 2] output contract; keeping it in the XLA wrapper preserves
    # lane-dense kernel stores (a lane-2 last dim in-kernel would be masked vst).
    return jnp.stack([pha, amp], axis=-1)


def _reference(x):
    """Pure-JAX reference mirroring the torch module."""
    n = x.shape[-1]
    f = jnp.concatenate([
        jnp.arange(0, (n - 1) // 2 + 1) / float(n),
        jnp.arange(-(n // 2), 0) / float(n),
    ])
    u = jax.nn.sigmoid(50.0 * f)
    xf = jnp.fft.fft(x, n=n, axis=-1)
    y = jnp.fft.ifft(xf * 2.0 * u, axis=-1)
    pha = jnp.arctan2(y.imag, y.real)
    amp = jnp.abs(y)
    return jnp.stack([pha, amp], axis=-1)


if __name__ == "__main__":
    key = jax.random.PRNGKey(0)
    x = jax.random.normal(key, (2, 4, 16, 16), dtype=jnp.float32)

    out = hilbert_forward(x)
    out = jax.block_until_ready(out)

    assert out.shape == (2, 4, 16, 16, 2), out.shape
    ref = _reference(x)
    np.testing.assert_allclose(np.asarray(out), np.asarray(ref),
                               rtol=1e-4, atol=1e-4)
    print("KERNEL_OK")
</pallas_src>

<mosaic_0001>
module attributes {stable_mosaic.version = 11 : i64} {
  func.func @_hilbert_kernel(%arg0: i32, %arg1: memref<16x128xf32, #tpu.memory_space<vmem>>, %arg2: memref<128x256xf32, #tpu.memory_space<vmem>>, %arg3: memref<16x128xf32, #tpu.memory_space<vmem>>, %arg4: memref<16x128xf32, #tpu.memory_space<vmem>>) attributes {dimension_semantics = [#tpu.dimension_semantics<parallel>], iteration_bounds = array<i64: 1>, scalar_prefetch = 0 : i64, scratch_operands = 0 : i64, tpu.core_type = #tpu.core_type<tc>, window_params = [{transform_indices = @transform_0, window_bounds = array<i64: 16, 128>}, {pipeline_mode = #tpu.pipeline_mode<synchronous>, transform_indices = @transform_1, window_bounds = array<i64: 128, 256>}, {transform_indices = @transform_2, window_bounds = array<i64: 16, 128>}, {transform_indices = @transform_3, window_bounds = array<i64: 16, 128>}]} {
    %c0 = arith.constant 0 : index
    %c0_0 = arith.constant 0 : index
    %0 = vector.load %arg1[%c0, %c0_0] : memref<16x128xf32, #tpu.memory_space<vmem>>, vector<16x128xf32>
    %c0_1 = arith.constant 0 : index
    %c0_2 = arith.constant 0 : index
    %1 = vector.load %arg2[%c0_1, %c0_2] : memref<128x256xf32, #tpu.memory_space<vmem>>, vector<128x256xf32>
    %cst = arith.constant dense<0.000000e+00> : vector<16x256xf32>
    %2 = tpu.matmul %0, %1, %cst {dimension_numbers = #tpu.dot_dimension_numbers<[1], [0], [0], [1], [0, 0, 1, 1], [], []>} : vector<16x128xf32>, vector<128x256xf32>, vector<16x256xf32> -> vector<16x256xf32>
    %3 = vector.extract_strided_slice %2 {offsets = [0, 0], sizes = [16, 128], strides = [1, 1]} : vector<16x256xf32> to vector<16x128xf32>
    %4 = vector.extract_strided_slice %2 {offsets = [0, 128], sizes = [16, 128], strides = [1, 1]} : vector<16x256xf32> to vector<16x128xf32>
    %5 = math.atan2 %4, %3 : vector<16x128xf32>
    %c0_3 = arith.constant 0 : index
    %c0_4 = arith.constant 0 : index
    %6 = vector.load %arg3[%c0_3, %c0_4] : memref<16x128xf32, #tpu.memory_space<vmem>>, vector<16x128xf32>
    tpu.vector_store %arg3[%c0_3, %c0_4], %5 {strides = array<i32>} : memref<16x128xf32, #tpu.memory_space<vmem>>, vector<16x128xf32>,
    %7 = arith.mulf %3, %3 : vector<16x128xf32>
    %8 = arith.mulf %4, %4 : vector<16x128xf32>
    %9 = arith.addf %7, %8 : vector<16x128xf32>
    %cst_5 = arith.constant 1.000000e-30 : f32
    %10 = vector.broadcast %cst_5 : f32 to vector<16x128xf32>
    %11 = arith.addf %9, %10 : vector<16x128xf32>
    %12 = math.rsqrt %11 : vector<16x128xf32>
    %13 = arith.mulf %9, %12 : vector<16x128xf32>
    %c0_6 = arith.constant 0 : index
    %c0_7 = arith.constant 0 : index
    %14 = vector.load %arg4[%c0_6, %c0_7] : memref<16x128xf32, #tpu.memory_space<vmem>>, vector<16x128xf32>
    tpu.vector_store %arg4[%c0_6, %c0_7], %13 {strides = array<i32>} : memref<16x128xf32, #tpu.memory_space<vmem>>, vector<16x128xf32>,
    return
  }
  func.func @transform_0(%arg0: i32) -> (i32, i32) {
    %c0_i32 = arith.constant 0 : i32
    %c0_i32_0 = arith.constant 0 : i32
    return %arg0, %c0_i32 : i32, i32
  }
  func.func @transform_1(%arg0: i32) -> (i32, i32) {
    %c0_i32 = arith.constant 0 : i32
    %c0_i32_0 = arith.constant 0 : i32
    %c0_i32_1 = arith.constant 0 : i32
    return %c0_i32, %c0_i32_0 : i32, i32
  }
  func.func @transform_2(%arg0: i32) -> (i32, i32) {
    %c0_i32 = arith.constant 0 : i32
    %c0_i32_0 = arith.constant 0 : i32
    return %arg0, %c0_i32 : i32, i32
  }
  func.func @transform_3(%arg0: i32) -> (i32, i32) {
    %c0_i32 = arith.constant 0 : i32
    %c0_i32_0 = arith.constant 0 : i32
    return %arg0, %c0_i32 : i32, i32
  }
}

</mosaic_0001>

<bundles_post_ra>
// kernel: hilbert_forward.1
= control target key start
LH: loop header
LB: loop body
LE: loop exit
PB: predicated region body
PF: predicated region fallthrough
CT: control target
= control target key end

     0   :  { %9 = vsyncpa [#allocation3], 0  ;;  %s343_s15 = smov [#allocation2]   ;;  %s344_s17 = smov 256   ;;  %s487_s0 = inlined_call_operand.vmem [shape: f32[16,128], index: 0, kind: input, shape index: {}]   ;;  %s488_s1 = inlined_call_operand.hbm [shape: f32[128,256], index: 1, kind: input, shape index: {}]   ;;  %s489_s2 = inlined_call_operand.vmem [shape: f32[16,128], index: 2, kind: output, shape index: {0}]   ;;  %s490_s3 = inlined_call_operand.vmem [shape: f32[16,128], index: 3, kind: output, shape index: {1}]  }
   0x1   :  { %s16_s14 = sshll.u32 %s488_s1, 4  ;;  %s18_s16 = sshll.u32 %s343_s15, 4  ;;  %s17_s14 = int_to_ptr.hbm [resolvable:$true] %s16_s14  ;;  %s19_s16 = int_to_ptr.vmem [resolvable:$true] %s18_s16 }
   0x2   :  { %s345_s18 = smov 16  }
   0x3   :  { %24 = dma.hbm_to_vmem [thread:$0]  %s17_s14, 4096, %s19_s16, [#allocation3], %s344_s17, %s344_s17, %s345_s18  }
   0x4   :  { %341 = dma.done.wait [#allocation3], 4096  }
   0x5   :  { %342 = vsyncadd [#allocation3], 4294963200  ;;  %v61_v0 = vld [vmem:[#allocation2 + $0xf0] sm:$0xff]  ;;  %v62_v1 = vld [vmem:[#allocation2 + $0xf8] sm:$0xff] }
   0x6   :  { %v59_v2 = vld [vmem:[#allocation2 + $0xe0] sm:$0xff]  ;;  %63 = vmatpush.msra.mxu0 %v61_v0  ;;  %272 = vmatpush.msra.mxu2 %v61_v0  ;;  %v60_v3 = vld [vmem:[#allocation2 + $0xe8] sm:$0xff]  ;;  %v57_v4 = vld [vmem:[#allocation2 + $0xd0] sm:$0xff] }
   0x7   :  { %86 = vmatpush.msra.mxu1 %v62_v1  ;;  %288 = vmatpush.msra.mxu3 %v62_v1  ;;  %v58_v5 = vld [vmem:[#allocation2 + $0xd8] sm:$0xff]  ;;  %v55_v6 = vld [vmem:[#allocation2 + $0xc0] sm:$0xff]  ;;  %v56_v7 = vld [vmem:[#allocation2 + $0xc8] sm:$0xff] }
   0x8   :  { %64 = vmatpush.msra.mxu0 %v59_v2  ;;  %273 = vmatpush.msra.mxu2 %v59_v2  ;;  %v53_v8 = vld [vmem:[#allocation2 + $0xb0] sm:$0xff]  ;;  %v54_v9 = vld [vmem:[#allocation2 + $0xb8] sm:$0xff]  ;;  %v51_v10 = vld [vmem:[#allocation2 + $0xa0] sm:$0xff] }
   0x9   :  { %87 = vmatpush.msra.mxu1 %v60_v3  ;;  %289 = vmatpush.msra.mxu3 %v60_v3  ;;  %v52_v11 = vld [vmem:[#allocation2 + $0xa8] sm:$0xff]  ;;  %v49_v12 = vld [vmem:[#allocation2 + $0x90] sm:$0xff]  ;;  %v50_v13 = vld [vmem:[#allocation2 + $0x98] sm:$0xff] }
   0xa   :  { %65 = vmatpush.msra.mxu0 %v57_v4  ;;  %274 = vmatpush.msra.mxu2 %v57_v4  ;;  %v47_v14 = vld [vmem:[#allocation2 + $0x80] sm:$0xff]  ;;  %v48_v15 = vld [vmem:[#allocation2 + $0x88] sm:$0xff]  ;;  %v45_v16 = vld [vmem:[#allocation2 + $0x70] sm:$0xff] }
   0xb   :  { %88 = vmatpush.msra.mxu1 %v58_v5  ;;  %290 = vmatpush.msra.mxu3 %v58_v5  ;;  %v46_v17 = vld [vmem:[#allocation2 + $0x78] sm:$0xff]  ;;  %v43_v18 = vld [vmem:[#allocation2 + $0x60] sm:$0xff]  ;;  %v44_v19 = vld [vmem:[#allocation2 + $0x68] sm:$0xff] }
   0xc   :  { %66 = vmatpush.msra.mxu0 %v55_v6  ;;  %275 = vmatpush.msra.mxu2 %v55_v6  ;;  %v41_v20 = vld [vmem:[#allocation2 + $0x50] sm:$0xff]  ;;  %v42_v21 = vld [vmem:[#allocation2 + $0x58] sm:$0xff]  ;;  %v39_v22 = vld [vmem:[#allocation2 + $0x40] sm:$0xff] }
   0xd   :  { %89 = vmatpush.msra.mxu1 %v56_v7  ;;  %291 = vmatpush.msra.mxu3 %v56_v7  ;;  %v40_v23 = vld [vmem:[#allocation2 + $0x48] sm:$0xff]  ;;  %v37_v24 = vld [vmem:[#allocation2 + $0x30] sm:$0xff]  ;;  %v38_v25 = vld [vmem:[#allocation2 + $0x38] sm:$0xff] }
   0xe   :  { %67 = vmatpush.msra.mxu0 %v53_v8  ;;  %276 = vmatpush.msra.mxu2 %v53_v8  ;;  %v35_v26 = vld [vmem:[#allocation2 + $0x20] sm:$0xff]  ;;  %v36_v27 = vld [vmem:[#allocation2 + $0x28] sm:$0xff]  ;;  %v33_v28 = vld [vmem:[#allocation2 + $0x10] sm:$0xff] }
   0xf   :  { %90 = vmatpush.msra.mxu1 %v54_v9  ;;  %292 = vmatpush.msra.mxu3 %v54_v9  ;;  %v34_v29 = vld [vmem:[#allocation2 + $0x18] sm:$0xff]  ;;  %v31_v30 = vld [vmem:[#allocation2] sm:$0xff]  ;;  %v32_v31 = vld [vmem:[#allocation2 + $0x8] sm:$0xff] }
  0x10   :  { %68 = vmatpush.msra.mxu0 %v51_v10  ;;  %277 = vmatpush.msra.mxu2 %v51_v10  ;;  %v29_v32 = vld [vmem:[%s487_s0] sm:$0xff]  ;;  %v30_v33 = vld [vmem:[%s487_s0 + $0x8] sm:$0xff] }
  0x11   :  { %91 = vmatpush.msra.mxu1 %v52_v11  ;;  %293 = vmatpush.msra.mxu3 %v52_v11 }
  0x12   :  { %69 = vmatpush.msra.mxu0 %v49_v12  ;;  %278 = vmatpush.msra.mxu2 %v49_v12 }
  0x13   :  { %92 = vmatpush.msra.mxu1 %v50_v13  ;;  %294 = vmatpush.msra.mxu3 %v50_v13 }
  0x14   :  { %70 = vmatpush.msra.mxu0 %v47_v14  ;;  %279 = vmatpush.msra.mxu2 %v47_v14 }
  0x15   :  { %93 = vmatpush.msra.mxu1 %v48_v15  ;;  %295 = vmatpush.msra.mxu3 %v48_v15 }
  0x16   :  { %71 = vmatpush.msra.mxu0 %v45_v16  ;;  %280 = vmatpush.msra.mxu2 %v45_v16 }
  0x17   :  { %94 = vmatpush.msra.mxu1 %v46_v17  ;;  %296 = vmatpush.msra.mxu3 %v46_v17 }
  0x18   :  { %72 = vmatpush.msra.mxu0 %v43_v18  ;;  %281 = vmatpush.msra.mxu2 %v43_v18 }
  0x19   :  { %95 = vmatpush.msra.mxu1 %v44_v19  ;;  %297 = vmatpush.msra.mxu3 %v44_v19 }
  0x1a   :  { %73 = vmatpush.msra.mxu0 %v41_v20  ;;  %282 = vmatpush.msra.mxu2 %v41_v20 }
  0x1b   :  { %96 = vmatpush.msra.mxu1 %v42_v21  ;;  %298 = vmatpush.msra.mxu3 %v42_v21 }
  0x1c   :  { %74 = vmatpush.msra.mxu0 %v39_v22  ;;  %283 = vmatpush.msra.mxu2 %v39_v22 }
  0x1d   :  { %97 = vmatpush.msra.mxu1 %v40_v23  ;;  %299 = vmatpush.msra.mxu3 %v40_v23 }
  0x1e   :  { %75 = vmatpush.msra.mxu0 %v37_v24  ;;  %284 = vmatpush.msra.mxu2 %v37_v24 }
  0x1f   :  { %98 = vmatpush.msra.mxu1 %v38_v25  ;;  %300 = vmatpush.msra.mxu3 %v38_v25 }
  0x20   :  { %76 = vmatpush.msra.mxu0 %v35_v26  ;;  %285 = vmatpush.msra.mxu2 %v35_v26 }
  0x21   :  { %99 = vmatpush.msra.mxu1 %v36_v27  ;;  %301 = vmatpush.msra.mxu3 %v36_v27 }
  0x22   :  { %77 = vmatpush.msra.mxu0 %v33_v28  ;;  %286 = vmatpush.msra.mxu2 %v33_v28 }
  0x23   :  { %100 = vmatpush.msra.mxu1 %v34_v29  ;;  %302 = vmatpush.msra.mxu3 %v34_v29 }
  0x24   :  { %78 = vmatpush.msra.mxu0 %v31_v30  ;;  %287 = vmatpush.msra.mxu2 %v31_v30 }
  0x25   :  { %101 = vmatpush.msra.mxu1 %v32_v31  ;;  %303 = vmatpush.msra.mxu3 %v32_v31 }
  0x26   :  { %79 = vmatmul.f32.vlgmr.msra.gmra.mxu0 %v29_v32  ;;  %82 = vmatmul.f32.vlgmr.msra.gmra.mxu2 %v30_v33 }
  0x27   :  { %102 = vmatmul.f32.vlgmr.msra.gmra.mxu1 %v29_v32  ;;  %105 = vmatmul.f32.vlgmr.msra.gmra.mxu3 %v30_v33 }
  0xa3   :  { %v377_v34 = vpop.f32.mrf.mxu0 }
  0xa4   :  { %v380_v35 = vand.u32 2147483647, %v377_v34  ;;  %vm156_vm0 = vcmp.ne.f32.partialorder %v377_v34, %v377_v34  ;;  %v384_v36 = vpop.f32.mrf.mxu1  ;;  %v231_v38 = vmul.f32 %v377_v34, %v377_v34 }
  0xa5   :  { %v387_v37 = vand.u32 2147483647, %v384_v36  ;;  %vm157_vm1 = vcmp.ne.f32.partialorder %v384_v36, %v384_v36  ;;  %v233_v42 = vmul.f32 %v384_v36, %v384_v36 }
  0xa6   :  { %vm162_vm2 = vcmp.eq.s32.totalorder %v380_v35, inf  ;;  %vm396_vm3 = vmor %vm156_vm0, %vm157_vm1 }
  0xa7   :  { %v112_v39 = vmax.f32 %v380_v35, %v387_v37  ;;  %vm163_vm4 = vcmp.eq.s32.totalorder %v387_v37, inf  ;;  %v409_v44 = vadd.f32 %v233_v42, %v231_v38  ;;  %v111_v5 = vmin.f32 %v380_v35, %v387_v37 }
  0xa8   :  { %vm401_vm5 = vmand %vm162_vm2, %vm163_vm4 }
  0xa9   :  { %309 = vrcp.f32 %v112_v39  ;;  %v407_v43 = vpop.f32.mrf.mxu2  ;;  %v237_v47 = vadd.f32 1e-30, %v409_v44  ;;  %v124_v58 = vand.u32 2147483648, %v112_v39  ;;  %vm118_vm12 = vweird.f32 %v112_v39 }
  0xaa   :  { %v412_v45 = vand.u32 2147483647, %v407_v43  ;;  %v414_v46 = vpop.f32.mrf.mxu3  ;;  %vm216_vm6 = vcmp.ne.f32.partialorder %v407_v43, %v407_v43  ;;  %v232_v49 = vmul.f32 %v407_v43, %v407_v43  ;;  %v122_v62 = vand.u32 2147483647, %v112_v39 }
  0xab   :  { %v420_v48 = vand.u32 2147483647, %v414_v46  ;;  %vm217_vm7 = vcmp.ne.f32.partialorder %v414_v46, %v414_v46  ;;  %311 = vrsqrt.f32 %v237_v47  ;;  %v234_v53 = vmul.f32 %v414_v46, %v414_v46 }
  0xac   :  { %vm222_vm8 = vcmp.eq.s32.totalorder %v412_v45, inf  ;;  %vm429_vm9 = vmor %vm216_vm6, %vm217_vm7  ;;  %v125_v2 = vor.u32 1.1754944e-38, %v124_v58  ;;  %vm123_vm15 = vcmp.eq.f32.partialorder %v122_v62, 8.507059e+37  ;;  %vm245_vm0 = vweird.f32 %v237_v47 }
  0xad   :  { %v172_v50 = vmax.f32 %v412_v45, %v420_v48  ;;  %vm223_vm10 = vcmp.eq.s32.totalorder %v420_v48, inf  ;;  %v440_v56 = vadd.f32 %v234_v53, %v232_v49  ;;  %v171_v24 = vmin.f32 %v412_v45, %v420_v48 }
  0xae   :  { %vm436_vm11 = vmand %vm222_vm8, %vm223_vm10 }
  0xaf   :  { %v310_v52 = vpop.eup %309  ;;  %313 = vrcp.f32 %v172_v50  ;;  %v238_v59 = vadd.f32 1e-30, %v440_v56  ;;  %v184_v11 = vand.u32 2147483648, %v172_v50  ;;  %v182_v15 = vand.u32 2147483647, %v172_v50 }
  0xb0   :  { %v114_v54 = vmul.f32 %v310_v52, %v112_v39  ;;  %vm119_vm13 = vweird.f32 %v310_v52  ;;  %vm178_vm6 = vweird.f32 %v172_v50 }
  0xb1   :  { %v312_v60 = vpop.eup %311  ;;  %315 = vrsqrt.f32 %v238_v59  ;;  %vm120_vm14 = vmor %vm118_vm12, %vm119_vm13  ;;  %v185_v21 = vor.u32 1.1754944e-38, %v184_v11  ;;  %vm183_vm8 = vcmp.eq.f32.partialorder %v182_v15, 8.507059e+37  ;;  %vm255_vm12 = vweird.f32 %v238_v59 }
  0xb2   :  { %v115_v57 = vsub.f32 1.0, %v114_v54  ;;  %v240_v63 = vmul.f32 %v312_v60, %v237_v47  ;;  %vm246_vm1 = vweird.f32 %v312_v60 }
  0xb3   :  { %vm247_vm4 = vmor %vm245_vm0, %vm246_vm1  ;;  %vm149_vm0 = vcmp.lt.f32.partialorder %v377_v34, 0.0  ;;  %vm154_vm1 = vcmp.eq.f32.partialorder %v384_v36, 0.0 }
  0xb4   :  { %v116_v61 = vmul.f32 %v310_v52, %v115_v57  ;;  %v241_v3 = vmul.f32 %v312_v60, %v240_v63 }
  0xb5   :  { %v314_v0 = vpop.eup %313 }
  0xb6   :  { %v117_v1 = vadd.f32 %v310_v52, %v116_v61  ;;  %v174_v4 = vmul.f32 %v314_v0, %v172_v50  ;;  %v242_v8 = vmul.f32 0.5, %v241_v3  ;;  %vm179_vm2 = vweird.f32 %v314_v0 }
  0xb7   :  { %v316_v12 = vpop.eup %315  ;;  %vm180_vm7 = vmor %vm178_vm6, %vm179_vm2  ;;  %vm206_vm2 = vcmp.gt.f32.partialorder %v420_v48, %v412_v45  ;;  %vm209_vm6 = vcmp.lt.f32.partialorder %v407_v43, 0.0 }
  0xb8   :  { %v121_v6 = vsel %vm120_vm14, %v310_v52, %v117_v1  ;;  %v175_v9 = vsub.f32 1.0, %v174_v4  ;;  %v243_v13 = vsub.f32 1.5, %v242_v8  ;;  %v250_v17 = vmul.f32 %v316_v12, %v238_v59 }
  0xb9   :  { %v126_v7 = vsel %vm123_vm15, %v125_v2, %v121_v6  ;;  %vm256_vm10 = vweird.f32 %v316_v12  ;;  %vm146_vm14 = vcmp.gt.f32.partialorder %v387_v37, %v380_v35  ;;  %vm152_vm15 = vcmp.lt.s32.totalorder %v377_v34, 0 }
  0xba   :  { %v445_v10 = vmul.f32 %v126_v7, %v111_v5  ;;  %v176_v14 = vmul.f32 %v314_v0, %v175_v9  ;;  %v244_v18 = vmul.f32 %v312_v60, %v243_v13  ;;  %v251_v22 = vmul.f32 %v316_v12, %v250_v17  ;;  %vm257_vm13 = vmor %vm255_vm12, %vm256_vm10 }
  0xbc   :  { %v128_v16 = vmul.f32 %v445_v10, %v445_v10  ;;  %v177_v19 = vadd.f32 %v314_v0, %v176_v14  ;;  %v248_v23 = vsel %vm247_vm4, %v312_v60, %v244_v18  ;;  %v252_v29 = vmul.f32 0.5, %v251_v22 }
  0xbd   :  { %v259_v27 = vmul.f32 %v248_v23, %v409_v44  ;;  %v347_v23 = vmov 0.7853982   ;;  %vm212_vm4 = vcmp.lt.s32.totalorder %v407_v43, 0 }
  0xbe   :  { %v129_v20 = vmul.f32 0.002785687, %v128_v16  ;;  %v181_v25 = vsel %vm180_vm7, %v314_v0, %v177_v19  ;;  %v253_v32 = vsub.f32 1.5, %v252_v29  ;;  %v221_v45 = vsel %vm209_vm6, 2.3561945, %v347_v23 }
  0xbf   :  { %v186_v28 = vsel %vm183_vm8, %v185_v21, %v181_v25  ;;  %261 = vst [vmem:[%s490_s3] sm:$0xff] %v259_v27 }
  0xc0   :  { %v130_v26 = vadd.f32 -0.015866, %v129_v20  ;;  %v187_v30 = vmul.f32 %v186_v28, %v171_v24  ;;  %v254_v39 = vmul.f32 %v316_v12, %v253_v32  ;;  %v161_v24 = vsel %vm149_vm0, 2.3561945, %v347_v23 }
  0xc1   :  { %v227_v32 = vand.u32 2147483648, %v414_v46 }
  0xc2   :  { %v131_v31 = vmul.f32 %v130_v26, %v128_v16  ;;  %v188_v33 = vmul.f32 %v187_v30, %v187_v30  ;;  %v258_v49 = vsel %vm257_vm13, %v316_v12, %v254_v39  ;;  %v167_v26 = vand.u32 2147483648, %v384_v36 }
  0xc3   :  { %v260_v44 = vmul.f32 %v258_v49, %v440_v56 }
  0xc4   :  { %v132_v38 = vadd.f32 0.04247222, %v131_v31  ;;  %v189_v42 = vmul.f32 0.002785687, %v188_v33 }
  0xc5   :  { %262 = vst [vmem:[%s490_s3 + $0x8] sm:$0xff] %v260_v44 }
  0xc6   :  { %v133_v47 = vmul.f32 %v132_v38, %v128_v16  ;;  %v190_v50 = vadd.f32 -0.015866, %v189_v42 }
  0xc8   :  { %v134_v52 = vadd.f32 -0.074975304, %v133_v47  ;;  %v191_v53 = vmul.f32 %v190_v50, %v188_v33 }
  0xca   :  { %v135_v54 = vmul.f32 %v134_v52, %v128_v16  ;;  %v192_v57 = vadd.f32 0.04247222, %v191_v53 }
  0xcc   :  { %v136_v58 = vadd.f32 0.1064488, %v135_v54  ;;  %v193_v60 = vmul.f32 %v192_v57, %v188_v33 }
  0xce   :  { %v137_v61 = vmul.f32 %v136_v58, %v128_v16  ;;  %v194_v62 = vadd.f32 -0.074975304, %v193_v60 }
  0xd0   :  { %v138_v59 = vadd.f32 -0.14207031, %v137_v61  ;;  %v195_v63 = vmul.f32 %v194_v62, %v188_v33 }
  0xd2   :  { %v139_v0 = vmul.f32 %v138_v59, %v128_v16  ;;  %v196_v1 = vadd.f32 0.1064488, %v195_v63 }
  0xd4   :  { %v140_v2 = vadd.f32 0.19993454, %v139_v0  ;;  %v197_v3 = vmul.f32 %v196_v1, %v188_v33 }
  0xd6   :  { %v141_v4 = vmul.f32 %v140_v2, %v128_v16  ;;  %v198_v56 = vadd.f32 -0.14207031, %v197_v3 }
  0xd8   :  { %v142_v5 = vadd.f32 -0.33333147, %v141_v4  ;;  %v199_v6 = vmul.f32 %v198_v56, %v188_v33 }
  0xda   :  { %v143_v7 = vmul.f32 %v142_v5, %v128_v16  ;;  %v200_v8 = vadd.f32 0.19993454, %v199_v6  ;;  %v346_v16 = vmov 0.0  }
  0xdb   :  { %v153_v20 = vsel %vm152_vm15, 3.1415927, %v346_v16 }
  0xdc   :  { %v144_v9 = vmul.f32 %v143_v7, %v445_v10  ;;  %v201_v11 = vmul.f32 %v200_v8, %v188_v33 }
  0xde   :  { %v145_v12 = vadd.f32 %v144_v9, %v445_v10  ;;  %v202_v13 = vadd.f32 -0.33333147, %v201_v11 }
  0xe0   :  { %v147_v14 = vsub.f32 1.5707964, %v145_v12  ;;  %v203_v15 = vmul.f32 %v202_v13, %v188_v33 }
  0xe2   :  { %v148_v17 = vsel %vm146_vm14, %v147_v14, %v145_v12  ;;  %v204_v19 = vmul.f32 %v203_v15, %v187_v30 }
  0xe3   :  { %v150_v18 = vsub.f32 3.1415927, %v148_v17 }
  0xe4   :  { %v205_v22 = vadd.f32 %v204_v19, %v187_v30  ;;  %v213_v30 = vsel %vm212_vm4, 3.1415927, %v346_v16 }
  0xe5   :  { %v151_v21 = vsel %vm149_vm0, %v150_v18, %v148_v17 }
  0xe6   :  { %v155_v10 = vsel %vm154_vm1, %v153_v20, %v151_v21  ;;  %v207_v37 = vsub.f32 1.5707964, %v205_v22 }
  0xe7   :  { %v159_v35 = vsel %vm396_vm3, nan, %v155_v10  ;;  %vm214_vm3 = vcmp.eq.f32.partialorder %v414_v46, 0.0 }
  0xe8   :  { %v165_v25 = vsel %vm401_vm5, %v161_v24, %v159_v35  ;;  %v208_v27 = vsel %vm206_vm2, %v207_v37, %v205_v22 }
  0xe9   :  { %v166_v34 = vand.u32 2147483647, %v165_v25  ;;  %v210_v28 = vsub.f32 3.1415927, %v208_v27 }
  0xeb   :  { %v168_v29 = vor.u32 %v167_v26, %v166_v34  ;;  %v211_v40 = vsel %vm209_vm6, %v210_v28, %v208_v27 }
  0xec   :  { %v215_v41 = vsel %vm214_vm3, %v213_v30, %v211_v40 }
  0xed   :  { %229 = vst [vmem:[%s489_s2] sm:$0xff] %v168_v29  ;;  %v219_v36 = vsel %vm429_vm9, nan, %v215_v41 }
  0xee   :  { %v225_v48 = vsel %vm436_vm11, %v221_v45, %v219_v36 }
  0xef   :  { %v226_v31 = vand.u32 2147483647, %v225_v48 }
  0xf1   :  { %v228_v43 = vor.u32 %v227_v32, %v226_v31 }
  0xf3   :  { %230 = vst [vmem:[%s489_s2 + $0x8] sm:$0xff] %v228_v43 }
  0xf4   :  { %271 = vsyncpa [#allocation3], 1 }

</bundles_post_ra>
